<compile_context>
chip_gen: v6e
topology: v6e:2x2x1
jax: 0.10.0
libtpu: 0.0.40
codegen_flags: <defaults>
</compile_context>

<pallas_src>
import jax
import jax.numpy as jnp
from jax.experimental import pallas as pl
from jax.experimental.pallas import tpu as pltpu

LANE = 128
SUBLANE = 8
MAX_TILE_ROWS = 2048  # ~2.3 MiB double-buffered x/out tiles at this size


def _round_up(n: int, m: int) -> int:
    return ((n + m - 1) // m) * m


def mlp_kernel(x_ref, w1_ref, b1_ref, w2_ref, b2_ref, w3_ref, b3_ref, o_ref):
    # x arrives as f32 (tiny per-row DMA); cast to bf16 in-kernel so the
    # wrapper needs no separate cast/copy pass over x.
    x = x_ref[...].astype(jnp.bfloat16)
    # Layer 1: Linear + ReLU (bf16 operands, f32 MXU accumulation)
    h1 = jnp.dot(x, w1_ref[...], preferred_element_type=jnp.float32)
    h1 = jnp.maximum(h1 + b1_ref[...], 0.0)
    # Layer 2: Linear + ReLU
    h2 = jnp.dot(h1.astype(jnp.bfloat16), w2_ref[...],
                 preferred_element_type=jnp.float32)
    h2 = jnp.maximum(h2 + b2_ref[...], 0.0)
    # Layer 3: Linear (lane-padded output, no activation)
    o = jnp.dot(h2.astype(jnp.bfloat16), w3_ref[...],
                preferred_element_type=jnp.float32)
    o_ref[...] = (o + b3_ref[...]).astype(o_ref.dtype)


def prepare_params(params):
    """One-time weight prep (hoisted out of the per-call hot path):
    bf16 matmul operands, f32 biases, last layer zero-padded to a lane-dense
    multiple of 128 output columns."""
    out_dim = params["w3"].shape[1]
    out_pad = _round_up(out_dim, LANE)
    w1 = params["w1"].astype(jnp.bfloat16)
    w2 = params["w2"].astype(jnp.bfloat16)
    w3 = jnp.pad(params["w3"], ((0, 0), (0, out_pad - out_dim))).astype(jnp.bfloat16)
    b1 = params["b1"].astype(jnp.float32)
    b2 = params["b2"].astype(jnp.float32)
    b3 = jnp.pad(params["b3"], ((0, 0), (0, out_pad - out_dim))).astype(jnp.float32)
    return (w1, b1, w2, b2, w3, b3)


def _choose_batch_tile(B: int):
    """Batch tile / grid selection (static, at trace time).

    - tile rows are a multiple of 8 (sublane), capped at MAX_TILE_ROWS;
    - >=2 grid steps whenever the batch allows it, so v7x's second TensorCore
      gets work via the "parallel" grid axis (one extra step costs ~0.35 us on
      single-TC v5e/v6e -> negligible);
    - tile sized so the last tile is nearly full (no large tail padding).
    """
    rows = _round_up(B, SUBLANE)
    if rows >= 2 * SUBLANE:
        n_tiles = max(2, pl.cdiv(rows, MAX_TILE_ROWS))
    else:
        n_tiles = 1
    tb = _round_up(pl.cdiv(rows, n_tiles), SUBLANE)
    grid = pl.cdiv(rows, tb)
    return tb, grid


def _forward_impl(x, w1, b1, w2, b2, w3, b3, *, out_dim, out_dtype):
    B, in_dim = x.shape
    hidden = w1.shape[1]
    out_pad = w3.shape[1]
    tb, grid = _choose_batch_tile(B)
    b_pad = tb * grid
    x_p = x if b_pad == B else jnp.pad(x, ((0, b_pad - B), (0, 0)))

    const = lambda i: (0, 0)  # weights: same block every step -> VMEM-resident
    out = pl.pallas_call(
        mlp_kernel,
        out_shape=jax.ShapeDtypeStruct((b_pad, out_pad), out_dtype),
        grid=(grid,),
        in_specs=[
            pl.BlockSpec((tb, in_dim), lambda i: (i, 0)),
            pl.BlockSpec((in_dim, hidden), const),
            pl.BlockSpec((1, hidden), const),
            pl.BlockSpec((hidden, hidden), const),
            pl.BlockSpec((1, hidden), const),
            pl.BlockSpec((hidden, out_pad), const),
            pl.BlockSpec((1, out_pad), const),
        ],
        out_specs=pl.BlockSpec((tb, out_pad), lambda i: (i, 0)),
        compiler_params=pltpu.CompilerParams(
            dimension_semantics=("parallel",)),
    )(x_p, w1, b1, w2, b2, w3, b3)
    return out[:B, :out_dim].astype(jnp.float32)


def make_network_forward(params, out_dtype=jnp.float32):
    """Returns a jitted forward(x) closure. Weight conversion/padding happens
    once here, not per call. Set out_dtype=jnp.bfloat16 to halve the kernel's
    HBM writeback (needs precision sign-off for Q-values)."""
    prepped = prepare_params(params)
    out_dim = params["w3"].shape[1]

    @jax.jit
    def forward(x):
        return _forward_impl(x, *prepped, out_dim=out_dim, out_dtype=out_dtype)

    return forward


def init_params(key, in_dim, hidden, out_dim):
    """Deterministic synthetic init (uniform, PyTorch-Linear-like bounds)."""
    ks = jax.random.split(key, 6)

    def lin(kw, kb, fan_in, fan_out):
        bound = 1.0 / jnp.sqrt(fan_in)
        w = jax.random.uniform(kw, (fan_in, fan_out), jnp.float32, -bound, bound)
        b = jax.random.uniform(kb, (1, fan_out), jnp.float32, -bound, bound)
        return w, b

    w1, b1 = lin(ks[0], ks[1], in_dim, hidden)
    w2, b2 = lin(ks[2], ks[3], hidden, hidden)
    w3, b3 = lin(ks[4], ks[5], hidden, out_dim)
    return {"w1": w1, "b1": b1, "w2": w2, "b2": b2, "w3": w3, "b3": b3}


def reference_forward_f32(x, p):
    h1 = jnp.maximum(x @ p["w1"] + p["b1"], 0.0)
    h2 = jnp.maximum(h1 @ p["w2"] + p["b2"], 0.0)
    return h2 @ p["w3"] + p["b3"]


def reference_forward_bf16(x, p):
    bf = jnp.bfloat16
    h1 = jnp.dot(x.astype(bf), p["w1"].astype(bf),
                 preferred_element_type=jnp.float32) + p["b1"]
    h1 = jnp.maximum(h1, 0.0)
    h2 = jnp.dot(h1.astype(bf), p["w2"].astype(bf),
                 preferred_element_type=jnp.float32) + p["b2"]
    h2 = jnp.maximum(h2, 0.0)
    return jnp.dot(h2.astype(bf), p["w3"].astype(bf),
                   preferred_element_type=jnp.float32) + p["b3"]


if __name__ == "__main__":
    key = jax.random.PRNGKey(0)
    k_x, k_x2, k_p = jax.random.split(key, 3)

    B, in_dim, hidden, out_dim = 8, 16, 128, 4
    x = jax.random.normal(k_x, (B, in_dim), jnp.float32)
    params = init_params(k_p, in_dim, hidden, out_dim)

    forward = make_network_forward(params)  # weight prep + jit, once

    out = jax.block_until_ready(forward(x))
    assert out.shape == (B, out_dim)

    # Matches a bf16-operand / f32-accumulation reference tightly ...
    ref_bf16 = reference_forward_bf16(x, params)
    assert jnp.allclose(out, ref_bf16, atol=2e-3, rtol=2e-3)
    # ... and the full-f32 module semantics within bf16 rounding error.
    ref_f32 = reference_forward_f32(x, params)
    assert jnp.allclose(out, ref_f32, atol=3e-2, rtol=3e-2)

    # Odd batch size: exercises the >=2-grid-step / tail-tile path.
    B2 = 40
    x2 = jax.random.normal(k_x2, (B2, in_dim), jnp.float32)
    out2 = jax.block_until_ready(forward(x2))
    assert out2.shape == (B2, out_dim)
    assert jnp.allclose(out2, reference_forward_bf16(x2, params),
                        atol=2e-3, rtol=2e-3)
    assert jnp.allclose(out2, reference_forward_f32(x2, params),
                        atol=3e-2, rtol=3e-2)

    print("KERNEL_OK")
</pallas_src>

<mosaic_0001>
module attributes {stable_mosaic.version = 11 : i64} {
  func.func @mlp_kernel(%arg0: i32, %arg1: memref<8x16xf32, #tpu.memory_space<vmem>>, %arg2: memref<16x128xbf16, #tpu.memory_space<vmem>>, %arg3: memref<1x128xf32, #tpu.memory_space<vmem>>, %arg4: memref<128x128xbf16, #tpu.memory_space<vmem>>, %arg5: memref<1x128xf32, #tpu.memory_space<vmem>>, %arg6: memref<128x128xbf16, #tpu.memory_space<vmem>>, %arg7: memref<1x128xf32, #tpu.memory_space<vmem>>, %arg8: memref<8x128xf32, #tpu.memory_space<vmem>>) attributes {dimension_semantics = [#tpu.dimension_semantics<parallel>], iteration_bounds = array<i64: 1>, scalar_prefetch = 0 : i64, scratch_operands = 0 : i64, tpu.core_type = #tpu.core_type<tc>, window_params = [{transform_indices = @transform_0, window_bounds = array<i64: 8, 16>}, {pipeline_mode = #tpu.pipeline_mode<synchronous>, transform_indices = @transform_1, window_bounds = array<i64: 16, 128>}, {pipeline_mode = #tpu.pipeline_mode<synchronous>, transform_indices = @transform_2, window_bounds = array<i64: 1, 128>}, {pipeline_mode = #tpu.pipeline_mode<synchronous>, transform_indices = @transform_3, window_bounds = array<i64: 128, 128>}, {pipeline_mode = #tpu.pipeline_mode<synchronous>, transform_indices = @transform_4, window_bounds = array<i64: 1, 128>}, {pipeline_mode = #tpu.pipeline_mode<synchronous>, transform_indices = @transform_5, window_bounds = array<i64: 128, 128>}, {pipeline_mode = #tpu.pipeline_mode<synchronous>, transform_indices = @transform_6, window_bounds = array<i64: 1, 128>}, {transform_indices = @transform_7, window_bounds = array<i64: 8, 128>}]} {
    %c0 = arith.constant 0 : index
    %c0_0 = arith.constant 0 : index
    %0 = vector.load %arg1[%c0, %c0_0] : memref<8x16xf32, #tpu.memory_space<vmem>>, vector<8x16xf32>
    %1 = arith.truncf %0 : vector<8x16xf32> to vector<8x16xbf16>
    %c0_1 = arith.constant 0 : index
    %c0_2 = arith.constant 0 : index
    %2 = vector.load %arg2[%c0_1, %c0_2] : memref<16x128xbf16, #tpu.memory_space<vmem>>, vector<16x128xbf16>
    %cst = arith.constant dense<0.000000e+00> : vector<8x128xf32>
    %3 = tpu.matmul %1, %2, %cst {dimension_numbers = #tpu.dot_dimension_numbers<[1], [0], [0], [1], [0, 0, 1, 1], [], []>} : vector<8x16xbf16>, vector<16x128xbf16>, vector<8x128xf32> -> vector<8x128xf32>
    %c0_3 = arith.constant 0 : index
    %c0_4 = arith.constant 0 : index
    %4 = vector.load %arg3[%c0_3, %c0_4] : memref<1x128xf32, #tpu.memory_space<vmem>>, vector<1x128xf32>
    %5 = vector.broadcast %4 : vector<1x128xf32> to vector<8x128xf32>
    %6 = arith.addf %3, %5 : vector<8x128xf32>
    %cst_5 = arith.constant 0.000000e+00 : f32
    %7 = vector.broadcast %cst_5 : f32 to vector<8x128xf32>
    %8 = arith.maximumf %6, %7 : vector<8x128xf32>
    %9 = arith.truncf %8 : vector<8x128xf32> to vector<8x128xbf16>
    %c0_6 = arith.constant 0 : index
    %c0_7 = arith.constant 0 : index
    %10 = vector.load %arg4[%c0_6, %c0_7] : memref<128x128xbf16, #tpu.memory_space<vmem>>, vector<128x128xbf16>
    %cst_8 = arith.constant dense<0.000000e+00> : vector<8x128xf32>
    %11 = tpu.matmul %9, %10, %cst_8 {dimension_numbers = #tpu.dot_dimension_numbers<[1], [0], [0], [1], [0, 0, 1, 1], [], []>} : vector<8x128xbf16>, vector<128x128xbf16>, vector<8x128xf32> -> vector<8x128xf32>
    %c0_9 = arith.constant 0 : index
    %c0_10 = arith.constant 0 : index
    %12 = vector.load %arg5[%c0_9, %c0_10] : memref<1x128xf32, #tpu.memory_space<vmem>>, vector<1x128xf32>
    %13 = vector.broadcast %12 : vector<1x128xf32> to vector<8x128xf32>
    %14 = arith.addf %11, %13 : vector<8x128xf32>
    %cst_11 = arith.constant 0.000000e+00 : f32
    %15 = vector.broadcast %cst_11 : f32 to vector<8x128xf32>
    %16 = arith.maximumf %14, %15 : vector<8x128xf32>
    %17 = arith.truncf %16 : vector<8x128xf32> to vector<8x128xbf16>
    %c0_12 = arith.constant 0 : index
    %c0_13 = arith.constant 0 : index
    %18 = vector.load %arg6[%c0_12, %c0_13] : memref<128x128xbf16, #tpu.memory_space<vmem>>, vector<128x128xbf16>
    %cst_14 = arith.constant dense<0.000000e+00> : vector<8x128xf32>
    %19 = tpu.matmul %17, %18, %cst_14 {dimension_numbers = #tpu.dot_dimension_numbers<[1], [0], [0], [1], [0, 0, 1, 1], [], []>} : vector<8x128xbf16>, vector<128x128xbf16>, vector<8x128xf32> -> vector<8x128xf32>
    %c0_15 = arith.constant 0 : index
    %c0_16 = arith.constant 0 : index
    %20 = vector.load %arg7[%c0_15, %c0_16] : memref<1x128xf32, #tpu.memory_space<vmem>>, vector<1x128xf32>
    %21 = vector.broadcast %20 : vector<1x128xf32> to vector<8x128xf32>
    %22 = arith.addf %19, %21 : vector<8x128xf32>
    %c0_17 = arith.constant 0 : index
    %c0_18 = arith.constant 0 : index
    %23 = vector.load %arg8[%c0_17, %c0_18] : memref<8x128xf32, #tpu.memory_space<vmem>>, vector<8x128xf32>
    tpu.vector_store %arg8[%c0_17, %c0_18], %22 {strides = array<i32>} : memref<8x128xf32, #tpu.memory_space<vmem>>, vector<8x128xf32>,
    return
  }
  func.func @transform_0(%arg0: i32) -> (i32, i32) {
    %c0_i32 = arith.constant 0 : i32
    %c0_i32_0 = arith.constant 0 : i32
    return %arg0, %c0_i32 : i32, i32
  }
  func.func @transform_1(%arg0: i32) -> (i32, i32) {
    %c0_i32 = arith.constant 0 : i32
    %c0_i32_0 = arith.constant 0 : i32
    %c0_i32_1 = arith.constant 0 : i32
    return %c0_i32, %c0_i32_0 : i32, i32
  }
  func.func @transform_2(%arg0: i32) -> (i32, i32) {
    %c0_i32 = arith.constant 0 : i32
    %c0_i32_0 = arith.constant 0 : i32
    %c0_i32_1 = arith.constant 0 : i32
    return %c0_i32, %c0_i32_0 : i32, i32
  }
  func.func @transform_3(%arg0: i32) -> (i32, i32) {
    %c0_i32 = arith.constant 0 : i32
    %c0_i32_0 = arith.constant 0 : i32
    %c0_i32_1 = arith.constant 0 : i32
    return %c0_i32, %c0_i32_0 : i32, i32
  }
  func.func @transform_4(%arg0: i32) -> (i32, i32) {
    %c0_i32 = arith.constant 0 : i32
    %c0_i32_0 = arith.constant 0 : i32
    %c0_i32_1 = arith.constant 0 : i32
    return %c0_i32, %c0_i32_0 : i32, i32
  }
  func.func @transform_5(%arg0: i32) -> (i32, i32) {
    %c0_i32 = arith.constant 0 : i32
    %c0_i32_0 = arith.constant 0 : i32
    %c0_i32_1 = arith.constant 0 : i32
    return %c0_i32, %c0_i32_0 : i32, i32
  }
  func.func @transform_6(%arg0: i32) -> (i32, i32) {
    %c0_i32 = arith.constant 0 : i32
    %c0_i32_0 = arith.constant 0 : i32
    %c0_i32_1 = arith.constant 0 : i32
    return %c0_i32, %c0_i32_0 : i32, i32
  }
  func.func @transform_7(%arg0: i32) -> (i32, i32) {
    %c0_i32 = arith.constant 0 : i32
    %c0_i32_0 = arith.constant 0 : i32
    return %arg0, %c0_i32 : i32, i32
  }
}

</mosaic_0001>

<bundles_post_ra>
// kernel: forward.1
= control target key start
LH: loop header
LB: loop body
LE: loop exit
PB: predicated region body
PF: predicated region fallthrough
CT: control target
= control target key end

     0   :  { %12 = vsyncpa [#allocation3], 0  ;;  %s674_s0 = inlined_call_operand.hbm [shape: f32[8,16], index: 0, kind: input, shape index: {}]   ;;  %s675_s1 = inlined_call_operand.hbm [shape: bf16[16,128], index: 1, kind: input, shape index: {}]   ;;  %s676_s2 = inlined_call_operand.vmem [shape: f32[1,128], index: 2, kind: input, shape index: {}]   ;;  %s677_s3 = inlined_call_operand.hbm [shape: bf16[128,128], index: 3, kind: input, shape index: {}]   ;;  %s678_s4 = inlined_call_operand.vmem [shape: f32[1,128], index: 4, kind: input, shape index: {}]   ;;  %s679_s5 = inlined_call_operand.hbm [shape: bf16[128,128], index: 5, kind: input, shape index: {}]   ;;  %s680_s6 = inlined_call_operand.vmem [shape: f32[1,128], index: 6, kind: input, shape index: {}]   ;;  %s681_s7 = inlined_call_operand.vmem [shape: f32[8,128], index: 7, kind: output, shape index: {}]  }
   0x1   :  { %13 = vsyncpa [#allocation5], 0 }
   0x2   :  { %14 = vsyncpa [#allocation8], 0  ;;  %s573_s24 = smov [#allocation4]  }
   0x3   :  { %s30_s25 = sshll.u32 %s573_s24, 4  ;;  %s31_s25 = int_to_ptr.vmem [resolvable:$true] %s30_s25 }
   0x4   :  { %s495_s26 = scalar_lea.vmem %s31_s25, 128  ;;  %p500_p1 = scmp.lt.s32.totalorder %s31_s25, %s31_s25 }
   0x5   :  { %p496_p0 = scmp.ne.s32.totalorder %s31_s25, %s495_s26  ;;  %p501_p2 = scmp.lt.s32.totalorder %s495_s26, %s495_s26 }
   0x7   :  { %p502_p3 = por %p501_p2, %p500_p1 }
   0x9   :  { %p503_p4 = pnand %p502_p3, %p496_p0 }
   0xb   :  { %506 = shalt.err (!%p503_p4)
}
   0xc   :  { %s574_s27 = smov 64   ;;  %s575_s28 = smov 4  }
   0xd   :  { %36 = dma.hbm_to_vmem [thread:$0]  %s675_s1, 128, %s31_s25, [#allocation5], %s574_s27, %s574_s27, %s575_s28  }
   0xe   :  { %s576_s8 = smov [#allocation2]   ;;  %s577_s10 = smov [#allocation6]  }
   0xf   :  { %s21_s9 = sshll.u32 %s576_s8, 4  ;;  %s44_s11 = sshll.u32 %s577_s10, 4  ;;  %s22_s9 = int_to_ptr.vmem [resolvable:$true] %s21_s9  ;;  %s45_s11 = int_to_ptr.vmem [resolvable:$true] %s44_s11 }
  0x10   :  { %s515_s12 = scalar_lea.vmem %s22_s9, 128  ;;  %p520_p6 = scmp.lt.s32.totalorder %s22_s9, %s22_s9 }
  0x11   :  { %p516_p5 = scmp.ne.s32.totalorder %s22_s9, %s515_s12  ;;  %p521_p7 = scmp.lt.s32.totalorder %s515_s12, %s515_s12 }
  0x13   :  { %p522_p8 = por %p521_p7, %p520_p6 }
  0x15   :  { %p523_p9 = pnand %p522_p8, %p516_p5 }
  0x17   :  { %526 = shalt.err (!%p523_p9)
}
  0x18   :  { %24 = dma.hbm_to_vmem [thread:$0]  %s674_s0, 128, %s22_s9, [#allocation3]  }
  0x19   :  { %s535_s15 = scalar_lea.vmem %s45_s11, 1024  ;;  %p540_p11 = scmp.lt.s32.totalorder %s45_s11, %s45_s11 }
  0x1a   :  { %p536_p10 = scmp.ne.s32.totalorder %s45_s11, %s535_s15  ;;  %p541_p12 = scmp.lt.s32.totalorder %s535_s15, %s535_s15 }
  0x1c   :  { %p542_p13 = por %p541_p12, %p540_p11 }
  0x1e   :  { %p543_p0 = pnand %p542_p13, %p536_p10 }
  0x20   :  { %546 = shalt.err (!%p543_p0)
}
  0x21   :  { %50 = dma.hbm_to_vmem [thread:$0]  %s677_s3, 1024, %s45_s11, [#allocation5], %s574_s27, %s574_s27, %s575_s28  }
  0x22   :  { %s578_s17 = smov [#allocation7]  }
  0x23   :  { %s58_s18 = sshll.u32 %s578_s17, 4  ;;  %s59_s18 = int_to_ptr.vmem [resolvable:$true] %s58_s18 }
  0x24   :  { %s555_s19 = scalar_lea.vmem %s59_s18, 1024  ;;  %p560_p2 = scmp.lt.s32.totalorder %s59_s18, %s59_s18 }
  0x25   :  { %p556_p1 = scmp.ne.s32.totalorder %s59_s18, %s555_s19  ;;  %p561_p3 = scmp.lt.s32.totalorder %s555_s19, %s555_s19 }
  0x27   :  { %p562_p4 = por %p561_p3, %p560_p2 }
  0x29   :  { %p563_p5 = pnand %p562_p4, %p556_p1 }
  0x2b   :  { %566 = shalt.err (!%p563_p5)
}
  0x2c   :  { %64 = dma.hbm_to_vmem [thread:$0]  %s679_s5, 1024, %s59_s18, [#allocation8], %s574_s27, %s574_s27, %s575_s28  }
  0x2d   :  { %567 = dma.done.wait [#allocation3], 128  }
  0x2e   :  { %568 = vsyncadd [#allocation3], 4294967168 }
  0x2f   :  { %569 = dma.done.wait [#allocation5], 1152  }
  0x30   :  { %570 = vsyncadd [#allocation5], 4294966144 }
  0x31   :  { %571 = dma.done.wait [#allocation8], 1024  }
  0x32   :  { %572 = vsyncadd [#allocation8], 4294966272  ;;  %v579_v0 = vmov 0.0   ;;  %vm580_vm0 = vmmov 0   ;;  %v470_v1 = vld [vmem:[#allocation4] sm:$0xff]   ;;  %v80_v2 = vld [vmem:[#allocation2] sm:$0xff] }
  0x33   :  { %416 = vmatprep.subr.bf16.mxu0 %v579_v0  ;;  %418 = vmatprep.mubr.msk.bf16.mxu0 %vm580_vm0, %v579_v0  ;;  %v81_v3 = vpack.c.bf16 %v80_v2, %v80_v2  ;;  %vm97_vm1 = vcmask 130048   ;;  %v471_v4 = vld [vmem:[#allocation6 + $0x38] sm:$0xff]   ;;  %v472_v5 = vld [vmem:[#allocation6 + $0x30] sm:$0xff]   ;;  %v473_v6 = vld [vmem:[#allocation6 + $0x28] sm:$0xff]  }
  0x34   :  { %422 = vmatprep.subr.bf16.mxu1 %v579_v0  ;;  %438 = vmatprep.mubr.msk.bf16.mxu1 %vm580_vm0, %v579_v0  ;;  %v474_v7 = vld [vmem:[#allocation6 + $0x20] sm:$0xff]   ;;  %v475_v8 = vld [vmem:[#allocation6 + $0x18] sm:$0xff]   ;;  %v476_v9 = vld [vmem:[#allocation6 + $0x10] sm:$0xff]  }
  0x35   :  { %417 = vmatpush3.bf16.msra.mxu0 %v470_v1  ;;  %423 = vmatpush3.bf16.msra.mxu1 %v471_v4  ;;  %v477_v10 = vld [vmem:[#allocation6 + $0x8] sm:$0xff]   ;;  %v478_v11 = vld [vmem:[#allocation6] sm:$0xff]   ;;  %v479_v12 = vld [vmem:[#allocation7 + $0x38] sm:$0xff]  }
  0x36   :  { %442 = vmatprep.subr.bf16.mxu0 %v579_v0  ;;  %424 = vmatprep.subr.bf16.mxu1 %v579_v0  ;;  %v480_v13 = vld [vmem:[#allocation7 + $0x30] sm:$0xff]   ;;  %v481_v14 = vld [vmem:[#allocation7 + $0x28] sm:$0xff]   ;;  %v482_v15 = vld [vmem:[#allocation7 + $0x20] sm:$0xff]  }
  0x37   :  { %v483_v16 = vld [vmem:[#allocation7 + $0x18] sm:$0xff]   ;;  %v484_v17 = vld [vmem:[#allocation7 + $0x10] sm:$0xff]   ;;  %v485_v26 = vld [vmem:[#allocation7 + $0x8] sm:$0xff]  }
  0x38   :  { %419 = vmatmul.mubr.msk.bf16.vlgmr.msra.gmra.mxu0 %vm97_vm1, %v81_v3  ;;  %v375_v18 = vld [vmem:[%s676_s2] ss:$0 sm:$0xff]  ;;  %v486_v27 = vld [vmem:[#allocation7] sm:$0xff]  }
  0x39   :  { %458 = vmatprep.mubr.msk.bf16.mxu0 %vm580_vm0, %v579_v0  ;;  %425 = vmatpush3.bf16.msra.mxu1 %v472_v5  ;;  %v378_v28 = vld [vmem:[%s678_s4] ss:$0 sm:$0xff] }
  0x3a   :  { %426 = vmatprep.subr.bf16.mxu1 %v579_v0  ;;  %443 = vmatpush3.bf16.msra.mxu0 %v479_v12  ;;  %v387_v36 = vld [vmem:[%s680_s6] ss:$0 sm:$0xff] }
  0x3b   :  { %444 = vmatprep.subr.bf16.mxu0 %v579_v0 }
  0x3d   :  { %427 = vmatpush3.bf16.msra.mxu1 %v473_v6 }
  0x3e   :  { %428 = vmatprep.subr.bf16.mxu1 %v579_v0  ;;  %445 = vmatpush3.bf16.msra.mxu0 %v480_v13 }
  0x3f   :  { %446 = vmatprep.subr.bf16.mxu0 %v579_v0 }
  0x41   :  { %429 = vmatpush3.bf16.msra.mxu1 %v474_v7 }
  0x42   :  { %430 = vmatprep.subr.bf16.mxu1 %v579_v0  ;;  %447 = vmatpush3.bf16.msra.mxu0 %v481_v14 }
  0x43   :  { %448 = vmatprep.subr.bf16.mxu0 %v579_v0 }
  0x45   :  { %431 = vmatpush3.bf16.msra.mxu1 %v475_v8 }
  0x46   :  { %432 = vmatprep.subr.bf16.mxu1 %v579_v0  ;;  %449 = vmatpush3.bf16.msra.mxu0 %v482_v15 }
  0x47   :  { %450 = vmatprep.subr.bf16.mxu0 %v579_v0 }
  0x49   :  { %433 = vmatpush3.bf16.msra.mxu1 %v476_v9 }
  0x4a   :  { %434 = vmatprep.subr.bf16.mxu1 %v579_v0  ;;  %451 = vmatpush3.bf16.msra.mxu0 %v483_v16 }
  0x4b   :  { %452 = vmatprep.subr.bf16.mxu0 %v579_v0 }
  0x4d   :  { %435 = vmatpush3.bf16.msra.mxu1 %v477_v10 }
  0x4e   :  { %436 = vmatprep.subr.bf16.mxu1 %v579_v0  ;;  %453 = vmatpush3.bf16.msra.mxu0 %v484_v17 }
  0x4f   :  { %454 = vmatprep.subr.bf16.mxu0 %v579_v0 }
  0x51   :  { %437 = vmatpush3.bf16.msra.mxu1 %v478_v11 }
  0x52   :  { %455 = vmatpush3.bf16.msra.mxu0 %v485_v26 }
  0x53   :  { %456 = vmatprep.subr.bf16.mxu0 %v579_v0 }
  0x56   :  { %457 = vmatpush3.bf16.msra.mxu0 %v486_v27 }
  0xf8   :  { %v135_v19 = vpop.f32.mrf.mxu0 }
  0xf9   :  { %v136_v20 = vadd.f32 %v375_v18, %v135_v19 }
  0xfa   :  { %v420_v21 = vpop.f32.mrf.mxu0 }
  0xfb   :  { %v141_v22 = vmax.f32 %v136_v20, 0.0 }
  0xfc   :  { %v138_v23 = vpop.f32.mrf.mxu0 }
  0xfd   :  { %v142_v24 = vpack.c.bf16 %v141_v22, %v141_v22 }
  0xfe   :  { %v421_v25 = vpop.f32.mrf.mxu0 }
  0xff   :  { %439 = vmatmul.mubr.bf16.vlgmr.msra.gmra.mxu1 %v142_v24 }
 0x1bf   :  { %v248_v29 = vpop.f32.mrf.mxu1 }
 0x1c0   :  { %v249_v30 = vadd.f32 %v378_v28, %v248_v29 }
 0x1c1   :  { %v440_v31 = vpop.f32.mrf.mxu1 }
 0x1c2   :  { %v254_v32 = vmax.f32 %v249_v30, 0.0 }
 0x1c3   :  { %v251_v33 = vpop.f32.mrf.mxu1 }
 0x1c4   :  { %v255_v34 = vpack.c.bf16 %v254_v32, %v254_v32 }
 0x1c5   :  { %v441_v35 = vpop.f32.mrf.mxu1 }
 0x1c6   :  { %459 = vmatmul.mubr.bf16.vlgmr.msra.gmra.mxu0 %v255_v34 }
 0x286   :  { %v361_v37 = vpop.f32.mrf.mxu0 }
 0x287   :  { %v362_v38 = vadd.f32 %v387_v36, %v361_v37 }
 0x288   :  { %v460_v39 = vpop.f32.mrf.mxu0 }
 0x289   :  { %367 = vst [vmem:[%s681_s7] sm:$0xff] %v362_v38 }
 0x28a   :  { %v364_v40 = vpop.f32.mrf.mxu0 }
 0x28c   :  { %v461_v41 = vpop.f32.mrf.mxu0 }
 0x28d   :  { %372 = vsyncpa [#allocation3], 1 }
 0x28e   :  { %373 = vsyncpa [#allocation5], 1 }
 0x28f   :  { %374 = vsyncpa [#allocation8], 1 }

</bundles_post_ra>
